<compile_context>
chip_gen: v7x
topology: tpu7x:2x2x1
jax: 0.10.0
libtpu: 0.0.40
codegen_flags: <defaults>
</compile_context>

<pallas_src>
import functools

import jax
import jax.numpy as jnp
from jax.experimental import pallas as pl
from jax.experimental.pallas import tpu as pltpu


def _avgpool_images_kernel(x_ref, o_ref, *, inv_n: float):
    # x_ref: (tile_b, N, tile_f) VMEM tile; o_ref: (tile_b, tile_f).
    # Sum with an f32 accumulator (no full-block pre-cast) then scale by the
    # compile-time constant 1/N -> matches AvgPool1d(N) exactly.
    acc = jnp.sum(x_ref[...], axis=1, dtype=jnp.float32)
    o_ref[...] = (acc * inv_n).astype(o_ref.dtype)


def _pick_tile_f(F: int, max_tile_f: int = 2048) -> int:
    """Largest multiple of 128 that divides F and is <= max_tile_f.

    If F is not a multiple of 128 (or is tiny), a full-extent block (= F) is
    always layout-legal on TPU, so use that.
    """
    if F <= 128 or F % 128 != 0:
        return F
    best = 128
    t = 128
    while t <= min(F, max_tile_f):
        if F % t == 0:
            best = t
        t += 128
    return best


def _pick_tile_b(B: int, N: int, tile_f: int, in_itemsize: int,
                 out_itemsize: int, budget_bytes: int) -> int:
    """Largest legal batch tile whose double-buffered blocks fit the budget.

    Legal tile_b values are B itself (full extent) or divisors of B that are
    multiples of 8 (sublane constraint on the (tile_b, tile_f) output block).
    """
    def fits(tb: int) -> bool:
        in_b = tb * N * tile_f * in_itemsize
        out_b = tb * tile_f * out_itemsize
        return 2 * (in_b + out_b) <= budget_bytes  # 2x for double-buffering

    cands = [B] + [d for d in range(B - 1, 0, -1) if B % d == 0 and d % 8 == 0]
    for tb in cands:  # descending; first fit is the largest
        if fits(tb):
            return tb
    return cands[-1]


def avg_pool_images(x: jax.Array,
                    *,
                    tile_b: int | None = None,
                    tile_f: int | None = None,
                    vmem_limit_bytes: int = 48 * 1024 * 1024,
                    min_pallas_bytes: int = 1 << 20,
                    force_pallas: bool = False) -> jax.Array:
    """x: (B, nbr_images, F) -> (B, F), mean over the images axis."""
    B, N, F = x.shape
    out_dtype = x.dtype
    out_itemsize = jnp.dtype(out_dtype).itemsize

    # Fast path: for tiny problems (the module default nbr_images=12 with small
    # B/F), pallas_call launch + DMA setup overhead dwarfs the reduction, so
    # let XLA fuse a plain mean.
    if not force_pallas and x.size * x.dtype.itemsize < min_pallas_bytes:
        return jnp.mean(x.astype(jnp.float32), axis=1).astype(out_dtype)

    if tile_f is None:
        tile_f = _pick_tile_f(F)
    assert F % tile_f == 0, (F, tile_f)
    if tile_b is None:
        tile_b = _pick_tile_b(B, N, tile_f, x.dtype.itemsize, out_itemsize,
                              budget_bytes=24 * 1024 * 1024)
    assert B % tile_b == 0, (B, tile_b)

    grid = (B // tile_b, F // tile_f)
    kernel = functools.partial(_avgpool_images_kernel, inv_n=1.0 / N)

    cost = pl.CostEstimate(
        flops=B * N * F,
        transcendentals=0,
        bytes_accessed=B * N * F * x.dtype.itemsize + B * F * out_itemsize,
    )

    return pl.pallas_call(
        kernel,
        out_shape=jax.ShapeDtypeStruct((B, F), out_dtype),
        grid_spec=pltpu.PrefetchScalarGridSpec(
            num_scalar_prefetch=0,
            grid=grid,
            in_specs=[
                pl.BlockSpec((tile_b, N, tile_f), lambda b, f: (b, 0, f)),
            ],
            out_specs=pl.BlockSpec((tile_b, tile_f), lambda b, f: (b, f)),
        ),
        compiler_params=pltpu.CompilerParams(
            dimension_semantics=("parallel", "parallel"),
            vmem_limit_bytes=vmem_limit_bytes,
        ),
        cost_estimate=cost,
    )(x)


def avg_pool_images_ref(x: jax.Array) -> jax.Array:
    # Pure-JAX reference mirroring the PyTorch module:
    # permute(0,2,1) -> (B, F, N); AvgPool1d(N) -> (B, F, 1); squeeze -> (B, F)
    xt = jnp.transpose(x, (0, 2, 1)).astype(jnp.float32)
    return jnp.mean(xt, axis=2).astype(x.dtype)


if __name__ == "__main__":
    nbr_images = 12          # module default
    B, F = 2, 256            # small batch / feature dims

    key = jax.random.PRNGKey(0)
    x = jax.random.normal(key, (B, nbr_images, F), dtype=jnp.float32)

    # f32 path (force the Pallas kernel even though the demo input is tiny).
    out = jax.block_until_ready(avg_pool_images(x, force_pallas=True))
    ref = avg_pool_images_ref(x)
    assert out.shape == (B, F), out.shape
    assert jnp.allclose(out, ref, atol=1e-5, rtol=1e-5), "f32 mismatch vs reference"

    # bf16 path: no wrapper pre-cast, f32 accumulation inside the kernel.
    xb = x.astype(jnp.bfloat16)
    outb = jax.block_until_ready(avg_pool_images(xb, force_pallas=True))
    refb = jnp.mean(xb.astype(jnp.float32), axis=1)
    assert outb.shape == (B, F) and outb.dtype == jnp.bfloat16
    assert jnp.allclose(outb.astype(jnp.float32), refb, atol=2e-2, rtol=2e-2), \
        "bf16 mismatch vs reference"

    # Tiny-problem fallback path (pure jnp.mean) should also agree.
    out_fb = jax.block_until_ready(avg_pool_images(x))
    assert jnp.allclose(out_fb, ref, atol=1e-5, rtol=1e-5), "fallback mismatch"

    print("KERNEL_OK")
</pallas_src>

<mosaic_0001>
module attributes {stable_mosaic.version = 11 : i64} {
  func.func @_avgpool_images_kernel(%arg0: i32, %arg1: i32, %arg2: memref<2x12x256xf32, #tpu.memory_space<vmem>>, %arg3: memref<2x256xf32, #tpu.memory_space<vmem>>) attributes {dimension_semantics = [#tpu.dimension_semantics<parallel>, #tpu.dimension_semantics<parallel>], iteration_bounds = array<i64: 1, 1>, scalar_prefetch = 0 : i64, scratch_operands = 0 : i64, tpu.core_type = #tpu.core_type<tc>, window_params = [{transform_indices = @transform_0, window_bounds = array<i64: 2, 12, 256>}, {transform_indices = @transform_1, window_bounds = array<i64: 2, 256>}]} {
    %c0 = arith.constant 0 : index
    %c0_0 = arith.constant 0 : index
    %c0_1 = arith.constant 0 : index
    %0 = vector.load %arg2[%c0, %c0_0, %c0_1] : memref<2x12x256xf32, #tpu.memory_space<vmem>>, vector<2x12x256xf32>
    %cst = arith.constant dense<0.000000e+00> : vector<2x256xf32>
    %1 = vector.multi_reduction <add>, %0, %cst [1] : vector<2x12x256xf32> to vector<2x256xf32>
    %cst_2 = arith.constant 0.0833333358 : f32
    %2 = vector.broadcast %cst_2 : f32 to vector<2x256xf32>
    %3 = arith.mulf %1, %2 : vector<2x256xf32>
    %c0_3 = arith.constant 0 : index
    %c0_4 = arith.constant 0 : index
    %4 = vector.load %arg3[%c0_3, %c0_4] : memref<2x256xf32, #tpu.memory_space<vmem>>, vector<2x256xf32>
    tpu.vector_store %arg3[%c0_3, %c0_4], %3 {strides = array<i32>} : memref<2x256xf32, #tpu.memory_space<vmem>>, vector<2x256xf32>,
    return
  }
  func.func @transform_0(%arg0: i32, %arg1: i32) -> (i32, i32, i32) {
    %c0_i32 = arith.constant 0 : i32
    %c0_i32_0 = arith.constant 0 : i32
    return %arg0, %c0_i32, %arg1 : i32, i32, i32
  }
  func.func @transform_1(%arg0: i32, %arg1: i32) -> (i32, i32) {
    %c0_i32 = arith.constant 0 : i32
    return %arg0, %arg1 : i32, i32
  }
}

</mosaic_0001>

<bundles_post_ra>
// kernel: tpu_custom_call.1
= control target key start
LH: loop header
LB: loop body
LE: loop exit
PB: predicated region body
PF: predicated region fallthrough
CT: control target
= control target key end

     0   :  { %vm17_vm0 = vcmask 1043456   ;;  %s177_s0 = inlined_call_operand.vmem [shape: f32[2,12,256], index: 0, kind: input, shape index: {}]   ;;  %s178_s1 = inlined_call_operand.hbm [shape: f32[2,256], index: 1, kind: output, shape index: {}]  }
   0x1   :  { %v9_v0 = vld [vmem:[%s177_s0] sm:$0xff]  ;;  %v10_v1 = vld [vmem:[%s177_s0 + $0x8] sm:$0xff]  ;;  %v11_v2 = vld [vmem:[%s177_s0 + $0x10] sm:$0xf] }
   0x2   :  { %v12_v3 = vld [vmem:[%s177_s0 + $0x18] sm:$0xf]  ;;  %v13_v4 = vld [vmem:[%s177_s0 + $0x20] sm:$0xff]  ;;  %v14_v5 = vld [vmem:[%s177_s0 + $0x28] sm:$0xff]  ;;  %v18_v6 = vsel %vm17_vm0, %v11_v2, 0.0 }
   0x3   :  { %v15_v7 = vld [vmem:[%s177_s0 + $0x30] sm:$0xf]  ;;  %v16_v8 = vld [vmem:[%s177_s0 + $0x38] sm:$0xf]  ;;  %v19_v9 = vadd.f32 %v18_v6, %v9_v0  ;;  %v26_v10 = vsel %vm17_vm0, %v12_v3, 0.0 }
   0x4   :  { %v27_v11 = vadd.f32 %v26_v10, %v10_v1  ;;  %v34_v12 = vsel %vm17_vm0, %v15_v7, 0.0  ;;  %v42_v13 = vsel %vm17_vm0, %v16_v8, 0.0 }
   0x5   :  { %6 = vsyncpa [#allocation3], 0  ;;  %v20_v14 = vrot.slane %v19_v9, 4  ;;  %v35_v15 = vadd.f32 %v34_v12, %v13_v4  ;;  %v43_v16 = vadd.f32 %v42_v13, %v14_v5  ;;  %v62_v26 = vlaneseq  ;;  %s130_s0 = smov [#allocation2]  }
   0x6   :  { %v28_v17 = vrot.slane %v27_v11, 4  ;;  %v129_v30 = vmov 1983009808   ;;  %vm79_vm1 = vcmask 1041409   ;;  %vm81_vm2 = vcmask 1043459   ;;  %s95_s22 = sshll.u32 %s130_s0, 4  ;;  %s96_s22 = int_to_ptr.vmem [resolvable:$true] %s95_s22 }
   0x7   :  { %v21_v18 = vadd.f32 %v20_v14, %v19_v9  ;;  %v36_v19 = vrot.slane %v35_v15, 4  ;;  %v44_v20 = vrot.slane %v43_v16, 4  ;;  %v60_v31 = vunpack.c.l.s4 %v129_v30  ;;  %s105_s23 = scalar_lea.vmem %s96_s22, 64  ;;  %p110_p1 = scmp.lt.s32.totalorder %s96_s22, %s96_s22 }
   0x8   :  { %v29_v21 = vadd.f32 %v28_v17, %v27_v11  ;;  %v63_v37 = vshrl.u32 %v62_v26, 7  ;;  %vm83_vm3 = vcmask 1045509   ;;  %vm85_vm4 = vcmask 1047559   ;;  %p106_p0 = scmp.ne.s32.totalorder %s96_s22, %s105_s23  ;;  %p111_p2 = scmp.lt.s32.totalorder %s105_s23, %s105_s23 }
   0x9   :  { %v22_v22 = vrot.slane %v21_v18, 2  ;;  %v37_v23 = vadd.f32 %v36_v19, %v35_v15  ;;  %v45_v24 = vadd.f32 %v44_v20, %v43_v16  ;;  %v61_v41 = vunpack.c.0.s8 %v60_v31 }
   0xa   :  { %v30_v25 = vrot.slane %v29_v21, 2  ;;  %p112_p3 = por %p111_p2, %p110_p1 }
   0xb   :  { %v23_v27 = vadd.f32 %v22_v22, %v21_v18  ;;  %v38_v28 = vrot.slane %v37_v23, 2  ;;  %v46_v29 = vrot.slane %v45_v24, 2  ;;  %v64_v49 = vsub.s32 %v61_v41, %v63_v37 }
   0xc   :  { %v31_v32 = vadd.f32 %v30_v25, %v29_v21  ;;  %p113_p4 = pnand %p112_p3, %p106_p0 }
   0xd   :  { %v24_v33 = vrot.slane %v23_v27, 1  ;;  %v39_v34 = vadd.f32 %v38_v28, %v37_v23  ;;  %v47_v35 = vadd.f32 %v46_v29, %v45_v24 }
   0xe   :  { %v32_v36 = vrot.slane %v31_v32, 1 }
   0xf   :  { %v25_v38 = vadd.f32 %v24_v33, %v23_v27  ;;  %v40_v39 = vrot.slane %v39_v34, 1  ;;  %v48_v40 = vrot.slane %v47_v35, 1 }
  0x10   :  { %v33_v42 = vadd.f32 %v32_v36, %v31_v32 }
  0x11   :  { %v41_v43 = vadd.f32 %v40_v39, %v39_v34  ;;  %v49_v44 = vadd.f32 %v48_v40, %v47_v35  ;;  %v50_v45 = vmul.f32 0.083333336, %v25_v38 }
  0x12   :  { %v51_v46 = vmul.f32 0.083333336, %v33_v42 }
  0x13   :  { %v52_v47 = vmul.f32 0.083333336, %v41_v43  ;;  %v53_v48 = vmul.f32 0.083333336, %v49_v44 }
  0x14   :  { %v58_v50 = vcombine.low %v50_v45, %v51_v46 }
  0x15   :  { %v66_v51 = vcombine.low %v52_v47, %v53_v48 }
  0x16   :  { %v65_v52 = vrot.slane %v58_v50, %v64_v49 }
  0x17   :  { %v73_v53 = vrot.slane %v66_v51, %v64_v49 }
  0x19   :  { %v78_v54 = vrot.slane %v73_v53, 7 }
  0x1b   :  { %v80_v55 = vsel %vm79_vm1, %v78_v54, %v65_v52 }
  0x1c   :  { %v82_v56 = vsel %vm81_vm2, %v78_v54, %v80_v55 }
  0x1d   :  { %v84_v57 = vsel %vm83_vm3, %v78_v54, %v82_v56 }
  0x1e   :  { %v86_v58 = vsel %vm85_vm4, %v78_v54, %v84_v57 }
  0x1f   :  { %88 = vst [vmem:[#allocation2] sm:$0xf] %v86_v58 }
  0x20   :  { %116 = shalt.err (!%p113_p4)
}
  0x21   :  { %s117_s26 = scalar_lea.hbm %s178_s1, 64 }
  0x22   :  { %p118_p5 = scmp.ne.s32.totalorder %s178_s1, %s117_s26  ;;  %p121_p6 = scmp.lt.u32.totalorder %s117_s26, %s178_s1 }
  0x24   :  { %p123_p7 = pnand %p121_p6, %p118_p5 }
  0x26   :  { %126 = shalt.err (!%p123_p7)
}
  0x27   :  { %98 = dma.vmem_to_hbm [thread:$0]  %s96_s22, 64, %s178_s1, [#allocation3]  }
  0x28   :  { %127 = dma.done.wait [#allocation3], 64  }
  0x29   :  { %128 = vsyncadd [#allocation3], 4294967232 }
  0x2a   :  { %102 = vsyncpa [#allocation3], 1 }

</bundles_post_ra>
